<compile_context>
chip_gen: v7x
topology: tpu7x:2x2x1
jax: 0.10.0
libtpu: 0.0.40
codegen_flags: <defaults>
</compile_context>

<pallas_src>
import jax
import jax.numpy as jnp
from jax.experimental import pallas as pl
from jax.experimental.pallas import tpu as pltpu


def _rope_kernel(cos_ref, sin_even_ref, sin_odd_ref, x_ref, o_ref):
    """Fused RoPE rotation on the interleaved layout.

    cos_ref      : (H, N) f32 -- cos duplicated per real/imag pair
    sin_even_ref : (H, N) f32 -- (-sin) at even lanes (real slots), 0 elsewhere
    sin_odd_ref  : (H, N) f32 -- (+sin) at odd  lanes (imag slots), 0 elsewhere
    x_ref        : (tb, H, N) input, native dtype (interleaved re/im pairs)
    o_ref        : (tb, H, N) float32 output

    With N = W * D and j the lane index:
      y[j] = cos[j]*x[j] + sin_even[j]*x[j+1] + sin_odd[j]*x[j-1]
    which is exactly
      y[2k]   = cos_k*x[2k]   - sin_k*x[2k+1]
      y[2k+1] = cos_k*x[2k+1] + sin_k*x[2k]
    """
    x = x_ref[...].astype(jnp.float32)
    n = x.shape[-1]
    ax = x.ndim - 1
    # Circular lane rotations (XLU).  Cross-pair wraparound contributions are
    # zeroed by the pre-signed / pre-masked sin tables.
    x_right = pltpu.roll(x, shift=n - 1, axis=ax)   # x_right[j] = x[(j + 1) % n]
    x_left = pltpu.roll(x, shift=1, axis=ax)        # x_left[j]  = x[(j - 1) % n]
    o_ref[...] = (x * cos_ref[...]
                  + x_right * sin_even_ref[...]
                  + x_left * sin_odd_ref[...])


def rope_pallas(x, dim=None, base=10000, target_block_bytes=1 << 20):
    """RoPE forward. x: (B, H, W, D). Returns float32 (B, H, W, D)."""
    B, H, W, D = x.shape
    if dim is None:
        dim = D
    assert dim == D, "feature dim of x must equal the module's `dim`"
    n_spatial = 2                      # len(x.shape[-3:-1])
    assert dim % (2 * n_spatial) == 0, "dim must be divisible by 4 for 2-D RoPE"
    k_max = dim // (2 * n_spatial)
    assert dim % k_max == 0

    # ---- glue: rotation tables (same math as the torch code) ----
    theta_ks = 1.0 / (base ** (jnp.arange(k_max, dtype=jnp.float32) / k_max))
    ang_h = jnp.arange(H, dtype=jnp.float32)[:, None, None] * theta_ks[None, None, :]
    ang_w = jnp.arange(W, dtype=jnp.float32)[None, :, None] * theta_ks[None, None, :]
    angles = jnp.concatenate(
        [jnp.broadcast_to(ang_h, (H, W, k_max)),
         jnp.broadcast_to(ang_w, (H, W, k_max))], axis=-1)          # (H, W, D//2)
    cos_t = jnp.cos(angles)
    sin_t = jnp.sin(angles)
    zeros = jnp.zeros_like(sin_t)

    # Expand to the full interleaved feature width D and flatten (W, D) -> N so
    # the kernel sees a lane-dense last axis.
    N = W * D
    cos_full = jnp.stack([cos_t, cos_t], axis=-1).reshape(H, N)      # (H, W*D)
    sin_even = jnp.stack([-sin_t, zeros], axis=-1).reshape(H, N)     # (H, W*D)
    sin_odd = jnp.stack([zeros, sin_t], axis=-1).reshape(H, N)       # (H, W*D)

    # ---- glue: lane-dense view of x (free contiguous reshape, native dtype) ----
    x2 = x.reshape(B, H, N)

    # ---- choose batch tile: big enough to hide per-step pipeline overhead,
    #      small enough to fit default scoped VMEM on every generation,
    #      and (when possible) >= 2 grid steps so v7x can use both TCs. ----
    per_batch_bytes = H * N * max(jnp.dtype(x.dtype).itemsize, 4)
    tb = 1
    for cand in range(1, B + 1):
        if B % cand:
            continue
        if cand * per_batch_bytes > target_block_bytes:
            break
        if B // cand >= 2 or B == 1:
            tb = cand
    grid = (B // tb,)

    out = pl.pallas_call(
        _rope_kernel,
        out_shape=jax.ShapeDtypeStruct((B, H, N), jnp.float32),
        grid=grid,
        in_specs=[
            pl.BlockSpec((H, N), lambda b: (0, 0)),          # cos_full (reused)
            pl.BlockSpec((H, N), lambda b: (0, 0)),          # sin_even (reused)
            pl.BlockSpec((H, N), lambda b: (0, 0)),          # sin_odd  (reused)
            pl.BlockSpec((tb, H, N), lambda b: (b, 0, 0)),   # x tile
        ],
        out_specs=pl.BlockSpec((tb, H, N), lambda b: (b, 0, 0)),
        compiler_params=pltpu.CompilerParams(
            dimension_semantics=("parallel",)),
    )(cos_full, sin_even, sin_odd, x2)

    # ---- glue: free contiguous reshape back to (B, H, W, D) ----
    return out.reshape(B, H, W, D)


def rope_ref(x, base=10000):
    """Pure-JAX reference mirroring the PyTorch forward, for validation."""
    B, H, W, D = x.shape
    k_max = D // 4
    theta_ks = 1.0 / (base ** (jnp.arange(k_max, dtype=jnp.float32) / k_max))
    hh, ww = jnp.meshgrid(jnp.arange(H, dtype=jnp.float32),
                          jnp.arange(W, dtype=jnp.float32), indexing="ij")
    angles = jnp.concatenate(
        [hh[..., None] * theta_ks, ww[..., None] * theta_ks], axis=-1)  # (H,W,D//2)
    c, s = jnp.cos(angles), jnp.sin(angles)
    xf = x.astype(jnp.float32).reshape(B, H, W, D // 2, 2)
    xr, xi = xf[..., 0], xf[..., 1]
    yr = c * xr - s * xi
    yi = s * xr + c * xi
    return jnp.stack([yr, yi], axis=-1).reshape(B, H, W, D)


if __name__ == "__main__":
    key = jax.random.PRNGKey(0)
    B, H, W, D = 2, 16, 16, 32          # dim = 32 -> k_max = 8, lane dim W*D = 512
    x = jax.random.normal(key, (B, H, W, D), dtype=jnp.float32)

    out = jax.block_until_ready(rope_pallas(x, dim=D))
    ref = rope_ref(x)
    assert out.shape == (B, H, W, D)
    assert out.dtype == jnp.float32
    assert bool(jnp.allclose(out, ref, atol=1e-5, rtol=1e-5)), "f32 mismatch vs reference"

    # Native-dtype input path (module upcasts to f32, so output stays f32).
    x_bf16 = x.astype(jnp.bfloat16)
    out_bf16 = jax.block_until_ready(rope_pallas(x_bf16, dim=D))
    ref_bf16 = rope_ref(x_bf16)
    assert out_bf16.dtype == jnp.float32
    assert bool(jnp.allclose(out_bf16, ref_bf16, atol=1e-5, rtol=1e-5)), "bf16 mismatch vs reference"

    print("KERNEL_OK")
</pallas_src>

<mosaic_0001>
module attributes {stable_mosaic.version = 11 : i64} {
  func.func @_rope_kernel(%arg0: i32, %arg1: memref<16x512xf32, #tpu.memory_space<vmem>>, %arg2: memref<16x512xf32, #tpu.memory_space<vmem>>, %arg3: memref<16x512xf32, #tpu.memory_space<vmem>>, %arg4: memref<1x16x512xf32, #tpu.memory_space<vmem>>, %arg5: memref<1x16x512xf32, #tpu.memory_space<vmem>>) attributes {dimension_semantics = [#tpu.dimension_semantics<parallel>], iteration_bounds = array<i64: 2>, scalar_prefetch = 0 : i64, scratch_operands = 0 : i64, tpu.core_type = #tpu.core_type<tc>, window_params = [{pipeline_mode = #tpu.pipeline_mode<synchronous>, transform_indices = @transform_0, window_bounds = array<i64: 16, 512>}, {pipeline_mode = #tpu.pipeline_mode<synchronous>, transform_indices = @transform_1, window_bounds = array<i64: 16, 512>}, {pipeline_mode = #tpu.pipeline_mode<synchronous>, transform_indices = @transform_2, window_bounds = array<i64: 16, 512>}, {transform_indices = @transform_3, window_bounds = array<i64: 1, 16, 512>}, {transform_indices = @transform_4, window_bounds = array<i64: 1, 16, 512>}]} {
    %c0 = arith.constant 0 : index
    %c0_0 = arith.constant 0 : index
    %c0_1 = arith.constant 0 : index
    %0 = vector.load %arg4[%c0, %c0_0, %c0_1] : memref<1x16x512xf32, #tpu.memory_space<vmem>>, vector<1x16x512xf32>
    %c511_i32 = arith.constant 511 : i32
    %1 = tpu.dynamic_rotate %0 by %c511_i32 dim 2 : vector<1x16x512xf32>, i32 -> vector<1x16x512xf32>
    %c1_i32 = arith.constant 1 : i32
    %2 = tpu.dynamic_rotate %0 by %c1_i32 dim 2 : vector<1x16x512xf32>, i32 -> vector<1x16x512xf32>
    %c0_2 = arith.constant 0 : index
    %c0_3 = arith.constant 0 : index
    %3 = vector.load %arg1[%c0_2, %c0_3] : memref<16x512xf32, #tpu.memory_space<vmem>>, vector<16x512xf32>
    %4 = vector.shape_cast %3 : vector<16x512xf32> to vector<1x16x512xf32>
    %5 = arith.mulf %0, %4 : vector<1x16x512xf32>
    %c0_4 = arith.constant 0 : index
    %c0_5 = arith.constant 0 : index
    %6 = vector.load %arg2[%c0_4, %c0_5] : memref<16x512xf32, #tpu.memory_space<vmem>>, vector<16x512xf32>
    %7 = vector.shape_cast %6 : vector<16x512xf32> to vector<1x16x512xf32>
    %8 = arith.mulf %1, %7 : vector<1x16x512xf32>
    %9 = arith.addf %5, %8 : vector<1x16x512xf32>
    %c0_6 = arith.constant 0 : index
    %c0_7 = arith.constant 0 : index
    %10 = vector.load %arg3[%c0_6, %c0_7] : memref<16x512xf32, #tpu.memory_space<vmem>>, vector<16x512xf32>
    %11 = vector.shape_cast %10 : vector<16x512xf32> to vector<1x16x512xf32>
    %12 = arith.mulf %2, %11 : vector<1x16x512xf32>
    %13 = arith.addf %9, %12 : vector<1x16x512xf32>
    %c0_8 = arith.constant 0 : index
    %c0_9 = arith.constant 0 : index
    %c0_10 = arith.constant 0 : index
    %14 = vector.load %arg5[%c0_8, %c0_9, %c0_10] : memref<1x16x512xf32, #tpu.memory_space<vmem>>, vector<1x16x512xf32>
    tpu.vector_store %arg5[%c0_8, %c0_9, %c0_10], %13 {strides = array<i32>} : memref<1x16x512xf32, #tpu.memory_space<vmem>>, vector<1x16x512xf32>,
    return
  }
  func.func @transform_0(%arg0: i32) -> (i32, i32) {
    %c0_i32 = arith.constant 0 : i32
    %c0_i32_0 = arith.constant 0 : i32
    %c0_i32_1 = arith.constant 0 : i32
    return %c0_i32, %c0_i32_0 : i32, i32
  }
  func.func @transform_1(%arg0: i32) -> (i32, i32) {
    %c0_i32 = arith.constant 0 : i32
    %c0_i32_0 = arith.constant 0 : i32
    %c0_i32_1 = arith.constant 0 : i32
    return %c0_i32, %c0_i32_0 : i32, i32
  }
  func.func @transform_2(%arg0: i32) -> (i32, i32) {
    %c0_i32 = arith.constant 0 : i32
    %c0_i32_0 = arith.constant 0 : i32
    %c0_i32_1 = arith.constant 0 : i32
    return %c0_i32, %c0_i32_0 : i32, i32
  }
  func.func @transform_3(%arg0: i32) -> (i32, i32, i32) {
    %c0_i32 = arith.constant 0 : i32
    %c0_i32_0 = arith.constant 0 : i32
    %c0_i32_1 = arith.constant 0 : i32
    return %arg0, %c0_i32, %c0_i32_0 : i32, i32, i32
  }
  func.func @transform_4(%arg0: i32) -> (i32, i32, i32) {
    %c0_i32 = arith.constant 0 : i32
    %c0_i32_0 = arith.constant 0 : i32
    %c0_i32_1 = arith.constant 0 : i32
    return %arg0, %c0_i32, %c0_i32_0 : i32, i32, i32
  }
}

</mosaic_0001>

<bundles_post_ra>
// kernel: tpu_custom_call.1
= control target key start
LH: loop header
LB: loop body
LE: loop exit
PB: predicated region body
PF: predicated region fallthrough
CT: control target
= control target key end

     0   :  { %9 = vsyncpa [#allocation3], 0  ;;  %s1181_s0 = inlined_call_operand.hbm [shape: f32[16,512], index: 0, kind: input, shape index: {}]   ;;  %s1182_s1 = inlined_call_operand.hbm [shape: f32[16,512], index: 1, kind: input, shape index: {}]   ;;  %s1183_s2 = inlined_call_operand.hbm [shape: f32[16,512], index: 2, kind: input, shape index: {}]   ;;  %s1184_s3 = inlined_call_operand.hbm [shape: f32[2,16,512], index: 3, kind: input, shape index: {}]   ;;  %s1185_s4 = inlined_call_operand.hbm [shape: f32[2,16,512], index: 4, kind: output, shape index: {}]  }
   0x1   :  { %10 = vsyncpa [#allocation6], 0 }
   0x2   :  { %11 = vsyncpa [#allocation9], 0 }
   0x3   :  { %13 = vsyncpa [#allocation9 + $0x1], 0 }
   0x4   :  { %14 = vsyncpa [#allocation4], 0 }
   0x5   :  { %16 = vsyncpa [#allocation4 + $0x1], 0  ;;  %s841_s15 = smov 0   ;;  %s843_s16 = smov 0  }
   0x6   :  { %s845_s17 = smov 0   ;;  %s847_s18 = smov 0  }
   0x7 LB: > { %s862_s19 = sadd.s32 4294967295, %s803_s18   ;;  %s510_s20 = sadd.s32 4294967294, %s803_s18   ;;  %s803_s18 = sphi %s847_s18, %s1208_s18   ;;  %s799_s17 = sphi %s845_s17, %s1207_s17   ;;  %s795_s16 = sphi %s843_s16, %s1206_s16   ;;  %s791_s15 = sphi %s841_s15, %s1205_s15  }
   0x8   : > { %p105_p0 = scmp.ne.s32.totalorder %s795_s16, %s791_s15  ;;  %p1186_p1 = scmp.eq.s32.totalorder %s862_s19, 0 }
   0x9   : > { %p135_p3 = scmp.eq.s32.totalorder %s510_s20, 1  ;;  %p511_p5 = scmp.ge.s32.totalorder %s803_s18, 1 }
   0xa   : > { %p871_p4 = por %p1186_p1, %p105_p0  ;;  %p142_p7 = scmp.lt.s32.totalorder %s803_s18, 3 }
   0xb   : > { %p876_p6 = por %p135_p3, %p105_p0  ;;  %s805_s24 = smov [#allocation5]  }
   0xc   : > { %s1189_s21 = scalar_select %p871_p4, 1, 0 }
   0xd   : > { %s1190_s22 = scalar_select %p876_p6, 1, 0 }
   0xe   : > { %p881_p8 = pnand %p511_p5, %p142_p7  ;;  %s167_s25 = sshll.u32 %s805_s24, 4  ;;  %s888_s25 = int_to_ptr.vmem [resolvable:$true] %s167_s25 }
   0xf   : > { %s806_s27 = smov [#allocation2]   ;;  %s807_s29 = smov [#allocation7]  }
  0x10   : > { %s1191_s23 = scalar_select %p881_p8, 1, 0 }
  0x11   : > { %p548_p10 = pneg %p881_p8  ;;  %s154_s28 = sshll.u32 %s806_s27, 4  ;;  %s896_s28 = int_to_ptr.vmem [resolvable:$true] %s154_s28 }
  0x12   : > { %s898_s30 = sshll.u32 %s807_s29, 4  ;;  %s615_s7 = scalar_lea.hbm %s1182_s1, 1024  ;;  %s181_s30 = int_to_ptr.vmem [resolvable:$true] %s898_s30 }
  0x13   : > { %p892_p11 = pnand %p548_p10, %p1186_p1  ;;  %p616_p12 = scmp.ne.s32.totalorder %s1182_s1, %s615_s7 }
  0x14   : > { %p622_p5 = scmp.lt.u32.totalorder %s615_s7, %s1182_s1 }
  0x15   : > { %p908_p13 = pneg %p892_p11 }
  0x17   : > { %p618_p0 = pnand %p908_p13, %p616_p12 }
  0x19   : > { %p619_p3 = pneg %p618_p0 }
  0x1b   : > { %p624_p7 = pnand %p622_p5, %p619_p3 }
  0x1d   : > { %627 = shalt.err (!%p624_p7)
}
  0x1e   : > { %s628_s13 = scalar_lea.vmem %s888_s25, 1024  ;;  %p636_p2 = scmp.lt.s32.totalorder %s888_s25, %s888_s25 }
  0x1f   : > { %p629_p10 = scmp.ne.s32.totalorder %s888_s25, %s628_s13  ;;  %p637_p6 = scmp.lt.s32.totalorder %s628_s13, %s628_s13 }
  0x21   : > { %p631_p9 = pnand %p629_p10, %p908_p13  ;;  %p638_p12 = por %p637_p6, %p636_p2 }
  0x23   : > { %p632_p1 = pneg %p631_p9 }
  0x25   : > { %p639_p0 = pnand %p638_p12, %p632_p1 }
  0x27   : > { %642 = shalt.err (!%p639_p0)
}
  0x28   : > { %s808_s14 = smov 512   ;;  %s809_s20 = smov 32  }
  0x29   : > { %554 = dma.hbm_to_vmem [thread:$0]  (!%p892_p11), %s1182_s1, 1024, %s888_s25, [#allocation6], %s808_s14, %s808_s14, %s809_s20  }
  0x2a   : > { %s643_s6 = scalar_lea.hbm %s1181_s0, 1024 }
  0x2b   : > { %p644_p1 = scmp.ne.s32.totalorder %s1181_s0, %s643_s6  ;;  %p650_p9 = scmp.lt.u32.totalorder %s643_s6, %s1181_s0 }
  0x2d   : > { %p646_p2 = pnand %p644_p1, %p908_p13 }
  0x2f   : > { %p647_p6 = pneg %p646_p2 }
  0x31   : > { %p652_p3 = pnand %p650_p9, %p647_p6 }
  0x33   : > { %655 = shalt.err (!%p652_p3)
}
  0x34   : > { %s656_s25 = scalar_lea.vmem %s896_s28, 1024  ;;  %p664_p12 = scmp.lt.s32.totalorder %s896_s28, %s896_s28 }
  0x35   : > { %p657_p5 = scmp.ne.s32.totalorder %s896_s28, %s656_s25  ;;  %p665_p0 = scmp.lt.s32.totalorder %s656_s25, %s656_s25 }
  0x37   : > { %p659_p7 = pnand %p657_p5, %p908_p13  ;;  %p666_p1 = por %p665_p0, %p664_p12 }
  0x39   : > { %p660_p10 = pneg %p659_p7 }
  0x3b   : > { %p667_p2 = pnand %p666_p1, %p660_p10 }
  0x3d   : > { %670 = shalt.err (!%p667_p2)
}
  0x3e   : > { %551 = dma.hbm_to_vmem [thread:$0]  (!%p892_p11), %s1181_s0, 1024, %s896_s28, [#allocation3], %s808_s14, %s808_s14, %s809_s20  }
  0x3f   : > { %s671_s29 = scalar_lea.hbm %s1183_s2, 1024 }
  0x40   : > { %p672_p6 = scmp.ne.s32.totalorder %s1183_s2, %s671_s29  ;;  %p678_p5 = scmp.lt.u32.totalorder %s671_s29, %s1183_s2 }
  0x42   : > { %p674_p9 = pnand %p672_p6, %p908_p13 }
  0x44   : > { %p675_p3 = pneg %p674_p9 }
  0x46   : > { %p680_p7 = pnand %p678_p5, %p675_p3 }
  0x48   : > { %683 = shalt.err (!%p680_p7)
}
  0x49   : > { %s684_s9 = scalar_lea.vmem %s181_s30, 1024  ;;  %p692_p1 = scmp.lt.s32.totalorder %s181_s30, %s181_s30 }
  0x4a   : > { %p685_p10 = scmp.ne.s32.totalorder %s181_s30, %s684_s9  ;;  %p693_p2 = scmp.lt.s32.totalorder %s684_s9, %s684_s9 }
  0x4c   : > { %p687_p12 = pnand %p685_p10, %p908_p13  ;;  %p694_p4 = por %p693_p2, %p692_p1 }
  0x4e   : > { %p688_p0 = pneg %p687_p12 }
  0x50   : > { %p695_p8 = pnand %p694_p4, %p688_p0 }
  0x52   : > { %698 = shalt.err (!%p695_p8)
}
  0x53   : > { %557 = dma.hbm_to_vmem [thread:$0]  (!%p892_p11), %s1183_s2, 1024, %s181_s30, [#allocation6], %s808_s14, %s808_s14, %s809_s20  }
  0x54   : > { %s981_s10 = sadd.s32 1, %s803_s18   ;;  %s92_s25 = sadd.s32 1, %s799_s17 }
  0x55   : > { %s89_s26 = ssub.s32 %s803_s18, %s981_s10  ;;  %p99_p8 = scmp.ne.s32.totalorder %s799_s17, %s795_s16 }
  0x56   : > { %p90_p4 = scmp.eq.s32.totalorder %s89_s26, 0  ;;  %p100_p13 = scmp.eq.s32.totalorder %s803_s18, 0 }
  0x57   : > { %p569_p6 = scmp.lt.s32.totalorder %s803_s18, 2  ;;  %p1194_p3 = scmp.eq.s32.totalorder %s862_s19, 1 }
  0x58   : > { %s991_s12 = scalar_select %p90_p4, %s799_s17, %s92_s25  }
  0x59   : > { %p101_p9 = por %p100_p13, %p99_p8  ;;  %p995_p5 = por %p1194_p3, %p99_p8 }
  0x5a   : > { %s194_s24 = sand.u32 1, %s799_s17   ;;  %s530_s27 = sshll.u32 %s803_s18, 10 }
  0x5b   : > { %s516_s30 = sshll.u32 %s194_s24, 6  ;;  %s1004_s6 = scalar_lea.hbm %s1184_s3, %s530_s27 }
  0x5c   : > { %s198_s7 = scalar_lea.vmem [#allocation8], %s516_s30  ;;  %p1006_p11 = pnand %p569_p6, %p101_p9 }
  0x5d   : > { %s205_s8 = sshll.u32 %s198_s7, 4  ;;  %s1012_s28 = scalar_lea.sflag [#allocation9], %s194_s24  ;;  %s1010_s8 = int_to_ptr.vmem [resolvable:$true] %s205_s8 }
  0x5e   : > { %s699_s11 = scalar_lea.hbm %s1004_s6, 1024  ;;  %p701_p10 = pneg %p1006_p11 }
  0x5f   : > { %p700_p7 = scmp.ne.s32.totalorder %s1004_s6, %s699_s11  ;;  %s704_s27 = scalar_lea.hbm %s1184_s3, 2048 }
  0x60   : > { %p705_p1 = scmp.lt.u32.totalorder %s1004_s6, %s1184_s3  ;;  %p706_p2 = scmp.lt.u32.totalorder %s704_s27, %s699_s11 }
  0x61   : > { %p702_p12 = pnand %p701_p10, %p700_p7  ;;  %p708_p8 = scmp.lt.u32.totalorder %s699_s11, %s1004_s6 }
  0x62   : > { %p707_p4 = por %p706_p2, %p705_p1 }
  0x63   : > { %p703_p0 = pneg %p702_p12 }
  0x64   : > { %p709_p13 = por %p708_p8, %p707_p4 }
  0x66   : > { %p710_p6 = pnand %p709_p13, %p703_p0 }
  0x68   : > { %713 = shalt.err (!%p710_p6)
}
  0x69   : > { %s714_s24 = scalar_lea.vmem %s1010_s8, 1024  ;;  %s810_s5 = smov [#allocation8]  }
  0x6a   : > { %p715_p9 = scmp.ne.s32.totalorder %s1010_s8, %s714_s24  ;;  %s719_s7 = sshll.u32 %s810_s5, 4  ;;  %s720_s7 = int_to_ptr.vmem [resolvable:$false] %s719_s7 }
  0x6b   : > { %s721_s26 = scalar_lea.vmem %s720_s7, 2048  ;;  %p722_p12 = scmp.lt.s32.totalorder %s1010_s8, %s720_s7 }
  0x6c   : > { %p717_p3 = pnand %p715_p9, %p701_p10  ;;  %p723_p1 = scmp.lt.s32.totalorder %s721_s26, %s714_s24 }
  0x6e   : > { %p718_p7 = pneg %p717_p3  ;;  %p724_p2 = por %p723_p1, %p722_p12 }
  0x70   : > { %p725_p4 = pnand %p724_p2, %p718_p7 }
  0x72   : > { %728 = shalt.err (!%p725_p4)
}
  0x73   : > { %561 = dma.hbm_to_vmem [thread:$0]  (!%p1006_p11), %s1004_s6, 1024, %s1010_s8, %s1012_s28, %s808_s14, %s808_s14, %s809_s20  }
  0x74   : > { %p1197_p10 = scmp.ne.s32.totalorder %s1191_s23, 0 }
  0x75   : > { %p1198_p0 = scmp.eq.s32.totalorder (!%p1197_p10), %s862_s19, 0 }
  0x76   : > { %217 = sbr.rel (%p1197_p10) target bundleno = 298 (0x12a), region = 36 }
  0x7d   : > { %774 = dma.done.wait (%p1198_p0), [#allocation3], 1024   ;;  %p1199_p8 = pmov %p1198_p0 }
  0x7e   : > { %p1200_p13 = pmov %p1198_p0 }
  0x7f   : > { %776 = vsyncadd (%p1199_p8), [#allocation3], 4294966272 }
  0x80   : > { %778 = dma.done.wait (%p1200_p13), [#allocation6], 2048   ;;  %p1201_p6 = pmov %p1198_p0 }
  0x81   : > { %s1054_s9 = sand.u32 1, %s795_s16   ;;  %p1202_p11 = scmp.ne.s32.totalorder %s1189_s21, 0 }
  0x82   : > { %780 = vsyncadd (%p1201_p6), [#allocation6], 4294965248  ;;  %s523_s23 = sshll.u32 %s1054_s9, 6  ;;  %s232_s14 = scalar_lea.sflag [#allocation9], %s1054_s9 }
  0x83   : > { %s235_s20 = scalar_lea.vmem [#allocation8], %s523_s23 }
  0x84   : > { %782 = dma.done.wait (%p1202_p11), %s232_s14, 1024  }
  0x85   : > { %784 = vsyncadd (%p1202_p11), %s232_s14, 4294966272  ;;  %v261_v0 = vld [vmem:[%s235_s20 + $0x8] sm:$0xff]  ;;  %v260_v1 = vld [vmem:[%s235_s20] sm:$0xff]  ;;  %s811_s6 = smov 127   ;;  %s812_s21 = smov 1   ;;  %v284_v10 = vlaneseq }
  0x86   : > { %272 = vrot.lane.b32.xlu1 %v261_v0, %s811_s6  ;;  %268 = vrot.lane.b32.xlu0 %v260_v1, %s811_s6  ;;  %v265_v2 = vld [vmem:[%s235_s20 + $0x28] sm:$0xff]  ;;  %v264_v3 = vld [vmem:[%s235_s20 + $0x20] sm:$0xff]  ;;  %v326_v28 = vld [vmem:[#allocation2 + $0x30] sm:$0xff]  ;;  %s1110_s8 = scalar_lea.vmem [#allocation10], %s523_s23  ;;  %s531_s28 = sshll.u32 %s862_s19, 10 }
  0x87   : > { %v266_v4 = vld [vmem:[%s235_s20 + $0x30] sm:$0xff]  ;;  %v1064_v6 = vld [vmem:[%s235_s20 + $0x38] sm:$0xff]  ;;  %v1072_v13 = vand.u32 127, %v284_v10  ;;  %v321_v16 = vld [vmem:[#allocation2 + $0x8] sm:$0xff]  ;;  %s406_s11 = sshll.u32 %s1110_s8, 4  ;;  %s1131_s27 = scalar_lea.hbm %s1185_s4, %s531_s28  ;;  %s1133_s11 = int_to_ptr.vmem [resolvable:$true] %s406_s11 }
  0x88   : > { %v262_v5 = vld [vmem:[%s235_s20 + $0x10] sm:$0xff]  ;;  %v1066_v7 = vld [vmem:[%s235_s20 + $0x18] sm:$0xff]  ;;  %v325_v19 = vld [vmem:[#allocation2 + $0x28] sm:$0xff]  ;;  %v329_v26 = vmul.f32 %v321_v16, %v261_v0  ;;  %v334_v38 = vmul.f32 %v326_v28, %v266_v4  ;;  %s393_s30 = scalar_lea.sflag [#allocation4], %s1054_s9  ;;  %s729_s29 = scalar_lea.vmem %s1133_s11, 1024 }
  0x89   : > { %vm286_vm0 = vcmp.lt.s32.totalorder %v1072_v13, 127  ;;  %v341_v20 = vld [vmem:[#allocation5 + $0x28] sm:$0xff]  ;;  %v320_v24 = vld [vmem:[#allocation2] sm:$0xff]  ;;  %v333_v27 = vmul.f32 %v325_v19, %v265_v2  ;;  %v322_v29 = vld [vmem:[#allocation2 + $0x10] sm:$0xff]  ;;  %vm311_vm1 = vcmp.lt.s32.totalorder %v1072_v13, 1  ;;  %p730_p9 = scmp.ne.s32.totalorder %s1133_s11, %s729_s29  ;;  %s813_s24 = smov [#allocation10]  }
  0x8a   : > { %274 = vrot.lane.b32.xlu1 %v265_v2, %s811_s6  ;;  %270 = vrot.lane.b32.xlu0 %v264_v3, %s811_s6  ;;  %v337_v22 = vld [vmem:[#allocation5 + $0x8] sm:$0xff]  ;;  %v324_v25 = vld [vmem:[#allocation2 + $0x20] sm:$0xff]  ;;  %v328_v34 = vmul.f32 %v320_v24, %v260_v1  ;;  %v327_v36 = vld [vmem:[#allocation2 + $0x38] sm:$0xff]  ;;  %v330_v39 = vmul.f32 %v322_v29, %v262_v5  ;;  %s733_s5 = sshll.u32 %s813_s24, 4  ;;  %s734_s5 = int_to_ptr.vmem [resolvable:$false] %s733_s5 }
  0x8b   : > { %v332_v35 = vmul.f32 %v324_v25, %v264_v3  ;;  %v342_v37 = vld [vmem:[#allocation5 + $0x30] sm:$0xff]  ;;  %v365_v43 = vld [vmem:[#allocation7 + $0x28] sm:$0xff]  ;;  %v323_v45 = vld [vmem:[#allocation2 + $0x18] sm:$0xff]  ;;  %p731_p3 = pnand %p730_p9, %p995_p5  ;;  %s735_s7 = scalar_lea.vmem %s734_s5, 2048 }
  0x8c   : > { %v338_v41 = vld [vmem:[#allocation5 + $0x10] sm:$0xff]  ;;  %v361_v44 = vld [vmem:[#allocation7 + $0x8] sm:$0xff]  ;;  %v336_v46 = vld [vmem:[#allocation5] sm:$0xff]  ;;  %p736_p12 = scmp.lt.s32.totalorder %s1133_s11, %s734_s5  ;;  %p737_p1 = scmp.lt.s32.totalorder %s735_s7, %s729_s29 }
  0x8d   : > { %v340_v48 = vld [vmem:[#allocation5 + $0x20] sm:$0xff]  ;;  %v343_v54 = vld [vmem:[#allocation5 + $0x38] sm:$0xff]  ;;  %p732_p7 = pneg %p731_p3 }
  0x8e   : > { %278 = vrot.lane.b32.xlu1 %v266_v4, %s811_s6  ;;  %276 = vrot.lane.b32.xlu0 %v262_v5, %s811_s6  ;;  %v339_v56 = vld [vmem:[#allocation5 + $0x18] sm:$0xff]  ;;  %v364_v19 = vld [vmem:[#allocation7 + $0x20] sm:$0xff]  ;;  %p738_p2 = por %p737_p1, %p736_p12 }
  0x8f   : > { %v363_v24 = vld [vmem:[#allocation7 + $0x18] sm:$0xff] }
  0x90   : > { %p739_p4 = pnand %p738_p2, %p732_p7 }
  0x92   : > { %282 = vrot.lane.b32.xlu1 %v1064_v6, %s811_s6  ;;  %280 = vrot.lane.b32.xlu0 %v1066_v7, %s811_s6 }
  0x96   : > { %297 = vrot.lane.b32.xlu1 %v264_v3, %s812_s21  ;;  %295 = vrot.lane.b32.xlu0 %v260_v1, %s812_s21  ;;  %v331_v1 = vmul.f32 %v323_v45, %v1066_v7 }
  0x9a   : > { %301 = vrot.lane.b32.xlu1 %v265_v2, %s812_s21  ;;  %299 = vrot.lane.b32.xlu0 %v261_v0, %s812_s21  ;;  %v335_v0 = vmul.f32 %v327_v36, %v1064_v6 }
  0x9e   : > { %305 = vrot.lane.b32.xlu1 %v266_v4, %s812_s21  ;;  %303 = vrot.lane.b32.xlu0 %v262_v5, %s812_s21  ;;  %v366_v4 = vld [vmem:[#allocation7 + $0x30] sm:$0xff] }
  0x9f   : > { %v362_v5 = vld [vmem:[#allocation7 + $0x10] sm:$0xff] }
  0xa2   : > { %309 = vrot.lane.b32.xlu1 %v1064_v6, %s812_s21  ;;  %307 = vrot.lane.b32.xlu0 %v1066_v7, %s812_s21 }
  0xf8   : > { %v273_v8 = vpop.permute.xlu1 %272  ;;  %v269_v9 = vpop.permute.xlu0 %268 }
  0xf9   : > { %v291_v47 = vsel %vm286_vm0, %v269_v9, %v273_v8 }
  0xfa   : > { %v344_v2 = vmul.f32 %v336_v46, %v291_v47 }
  0xfc   : > { %v275_v11 = vpop.permute.xlu1 %274  ;;  %v271_v12 = vpop.permute.xlu0 %270 }
  0xfd   : > { %v292_v49 = vsel %vm286_vm0, %v271_v12, %v275_v11 }
  0xfe   : > { %v348_v3 = vmul.f32 %v340_v48, %v292_v49 }
 0x100   : > { %v279_v14 = vpop.permute.xlu1 %278  ;;  %v277_v15 = vpop.permute.xlu0 %276 }
 0x101   : > { %v290_v21 = vsel %vm286_vm0, %v275_v11, %v279_v14  ;;  %v289_v23 = vsel %vm286_vm0, %v273_v8, %v277_v15 }
 0x102   : > { %v349_v30 = vmul.f32 %v341_v20, %v290_v21  ;;  %v345_v31 = vmul.f32 %v337_v22, %v289_v23  ;;  %v352_v20 = vadd.f32 %v344_v2, %v328_v34  ;;  %v356_v21 = vadd.f32 %v348_v3, %v332_v35  ;;  %v367_v22 = vld [vmem:[#allocation7 + $0x38] sm:$0xff]  ;;  %v360_v23 = vld [vmem:[#allocation7] sm:$0xff] }
 0x104   : > { %v283_v17 = vpop.permute.xlu1 %282  ;;  %v281_v18 = vpop.permute.xlu0 %280  ;;  %v357_v50 = vadd.f32 %v349_v30, %v333_v27  ;;  %v353_v51 = vadd.f32 %v345_v31, %v329_v26 }
 0x105   : > { %v288_v40 = vsel %vm286_vm0, %v279_v14, %v283_v17  ;;  %v287_v42 = vsel %vm286_vm0, %v277_v15, %v281_v18  ;;  %v294_v55 = vsel %vm286_vm0, %v283_v17, %v271_v12  ;;  %v293_v57 = vsel %vm286_vm0, %v281_v18, %v269_v9 }
 0x106   : > { %v350_v60 = vmul.f32 %v342_v37, %v288_v40  ;;  %v346_v61 = vmul.f32 %v338_v41, %v287_v42  ;;  %v351_v8 = vmul.f32 %v343_v54, %v294_v55  ;;  %v347_v9 = vmul.f32 %v339_v56, %v293_v57 }
 0x108   : > { %v1079_v32 = vpop.permute.xlu1 %297  ;;  %v1081_v33 = vpop.permute.xlu0 %295  ;;  %v358_v6 = vadd.f32 %v350_v60, %v334_v38  ;;  %v354_v17 = vadd.f32 %v346_v61, %v330_v39  ;;  %v359_v25 = vadd.f32 %v351_v8, %v335_v0  ;;  %v355_v26 = vadd.f32 %v347_v9, %v331_v1 }
 0x10c   : > { %v302_v52 = vpop.permute.xlu1 %301  ;;  %v300_v53 = vpop.permute.xlu0 %299 }
 0x10d   : > { %v317_v58 = vsel %vm311_vm1, %v1079_v32, %v302_v52  ;;  %v316_v59 = vsel %vm311_vm1, %v1081_v33, %v300_v53 }
 0x10e   : > { %v373_v62 = vmul.f32 %v365_v43, %v317_v58  ;;  %v369_v63 = vmul.f32 %v361_v44, %v316_v59 }
 0x110   : > { %v381_v10 = vadd.f32 %v373_v62, %v357_v50  ;;  %v377_v11 = vadd.f32 %v369_v63, %v353_v51  ;;  %v306_v12 = vpop.permute.xlu1 %305  ;;  %v304_v14 = vpop.permute.xlu0 %303 }
 0x111   : > { %v315_v15 = vsel %vm311_vm1, %v302_v52, %v306_v12  ;;  %v314_v16 = vsel %vm311_vm1, %v300_v53, %v304_v14 }
 0x112   : > { %389 = vst [vmem:[%s1110_s8 + $0x28] sm:$0xff] %v381_v10  ;;  %385 = vst [vmem:[%s1110_s8 + $0x8] sm:$0xff] %v377_v11  ;;  %v374_v7 = vmul.f32 %v366_v4, %v315_v15  ;;  %v370_v18 = vmul.f32 %v362_v5, %v314_v16 }
 0x114   : > { %v382_v27 = vadd.f32 %v374_v7, %v358_v6  ;;  %v378_v28 = vadd.f32 %v370_v18, %v354_v17  ;;  %v310_v29 = vpop.permute.xlu1 %309  ;;  %v308_v30 = vpop.permute.xlu0 %307 }
 0x115   : > { %v313_v31 = vsel %vm311_vm1, %v306_v12, %v310_v29  ;;  %v319_v34 = vsel %vm311_vm1, %v310_v29, %v1079_v32  ;;  %v312_v35 = vsel %vm311_vm1, %v304_v14, %v308_v30  ;;  %v318_v36 = vsel %vm311_vm1, %v308_v30, %v1081_v33 }
 0x116   : > { %390 = vst [vmem:[%s1110_s8 + $0x30] sm:$0xff] %v382_v27  ;;  %386 = vst [vmem:[%s1110_s8 + $0x10] sm:$0xff] %v378_v28  ;;  %v372_v37 = vmul.f32 %v364_v19, %v319_v34  ;;  %v375_v38 = vmul.f32 %v367_v22, %v313_v31  ;;  %v368_v39 = vmul.f32 %v360_v23, %v318_v36 }
 0x117   : > { %v371_v40 = vmul.f32 %v363_v24, %v312_v35 }
 0x118   : > { %v380_v13 = vadd.f32 %v372_v37, %v356_v21  ;;  %v383_v32 = vadd.f32 %v375_v38, %v359_v25  ;;  %v376_v33 = vadd.f32 %v368_v39, %v352_v20 }
 0x119   : > { %v379_v41 = vadd.f32 %v371_v40, %v355_v26 }
 0x11a   : > { %388 = vst [vmem:[%s1110_s8 + $0x20] sm:$0xff] %v380_v13  ;;  %391 = vst [vmem:[%s1110_s8 + $0x38] sm:$0xff] %v383_v32 }
 0x11b   : > { %384 = vst [vmem:[%s1110_s8] sm:$0xff] %v376_v33  ;;  %387 = vst [vmem:[%s1110_s8 + $0x18] sm:$0xff] %v379_v41 }
 0x11c   : > { %742 = shalt.err (!%p739_p4)
}
 0x11d   : > { %s743_s26 = scalar_lea.hbm %s1131_s27, 1024  ;;  %s747_s20 = scalar_lea.hbm %s1185_s4, 2048 }
 0x11e   : > { %p744_p10 = scmp.ne.s32.totalorder %s1131_s27, %s743_s26  ;;  %p748_p13 = scmp.lt.u32.totalorder %s1131_s27, %s1185_s4 }
 0x11f   : > { %p749_p6 = scmp.lt.u32.totalorder %s747_s20, %s743_s26  ;;  %p751_p9 = scmp.lt.u32.totalorder %s743_s26, %s1131_s27 }
 0x120   : > { %p745_p0 = pnand %p744_p10, %p995_p5 }
 0x121   : > { %p750_p11 = por %p749_p6, %p748_p13 }
 0x122   : > { %p746_p8 = pneg %p745_p0 }
 0x123   : > { %p752_p3 = por %p751_p9, %p750_p11 }
 0x125   : > { %p753_p7 = pnand %p752_p3, %p746_p8 }
 0x127   : > { %756 = shalt.err (!%p753_p7)
}
 0x128   : > { %s814_s8 = smov 512   ;;  %s815_s28 = smov 32  }
 0x129   : > { %546 = dma.vmem_to_hbm [thread:$0]  (%p995_p5), %s1133_s11, 1024, %s1131_s27, %s393_s30, %s814_s8, %s814_s8, %s815_s28  }
 0x12a PF: > { %s421_s19 = sand.u32 1, %s791_s15   ;;  %p1203_p12 = scmp.ne.s32.totalorder %s1190_s22, 0 }
 0x12b   : > { %p1204_p1 = scmp.ge.s32.totalorder %s803_s18, 2  ;;  %s422_s25 = scalar_lea.sflag [#allocation4], %s421_s19 }
 0x12d   : > { %p563_p2 = pnand %p1204_p1, %p1203_p12 }
 0x12f   : > { %786 = dma.done.wait (!%p563_p2), %s422_s25, 1024  }
 0x130   : > { %788 = vsyncadd (!%p563_p2), %s422_s25, 4294966272  ;;  %p19_p4 = scmp.ge.s32.totalorder %s981_s10, 4   ;;  %s1205_s15 = smov %s795_s16 }
 0x131   : > { %s1206_s16 = smov %s799_s17  ;;  %s1207_s17 = smov %s991_s12 }
 0x132   : > { %s1208_s18 = smov %s981_s10  ;;  %21 = sbr.rel (!%p19_p4) target bundleno = 7 (0x7), region = 94 }
 0x139   :  { %427 = vsyncpa [#allocation3], 1 }
 0x13a   :  { %429 = vsyncpa [#allocation3 + $0x1], 1 }
 0x13b   :  { %430 = vsyncpa [#allocation6], 1 }
 0x13c   :  { %431 = vsyncpa [#allocation9], 1 }
 0x13d   :  { %433 = vsyncpa [#allocation9 + $0x1], 1 }
 0x13e   :  { %434 = vsyncpa [#allocation4], 1 }
 0x13f   :  { %436 = vsyncpa [#allocation4 + $0x1], 1 }

</bundles_post_ra>
